<compile_context>
chip_gen: v5e
topology: v5e:2x2
jax: 0.10.0
libtpu: 0.0.40
codegen_flags: <defaults>
</compile_context>

<pallas_src>
import jax
import jax.numpy as jnp
from jax.experimental import pallas as pl
from jax.experimental.pallas import tpu as pltpu


def _reducer_bn_relu_kernel(x_ref, w_ref, scale_ref, bias_ref, o_ref):
    # x_ref: (C_in, T), w_ref: (C_out, C_in), scale/bias: (C_out, 1),
    # o_ref: (C_out, T).  Pixels live in the lane dim -> dense vld/vst.
    y = jnp.dot(w_ref[...], x_ref[...], preferred_element_type=jnp.float32)
    y = y * scale_ref[...] + bias_ref[...]
    o_ref[...] = jnp.maximum(y, 0.0).astype(o_ref.dtype)


def _reducer_conv_kernel(x_ref, w_ref, o_ref):
    # bn_relu=False path: plain 1x1 conv, no BN, no ReLU (matches PyTorch).
    o_ref[...] = jnp.dot(
        w_ref[...], x_ref[...], preferred_element_type=jnp.float32
    ).astype(o_ref.dtype)


def _round_up(x, m):
    return ((x + m - 1) // m) * m


def reducer_forward(x_nchw, conv_w, bn_gamma=None, bn_beta=None,
                    bn_mean=None, bn_var=None, *, bn_relu=True, eps=1e-5,
                    tile_hw=2048, vmem_limit_bytes=None):
    """x_nchw: (N, C_in, H, W); conv_w: (C_out, C_in) or (C_out, C_in, 1, 1)."""
    n, c_in, h, w = x_nchw.shape
    if conv_w.ndim == 4:  # PyTorch conv weight layout (C_out, C_in, 1, 1)
        conv_w = conv_w.reshape(conv_w.shape[0], conv_w.shape[1])
    c_out = conv_w.shape[0]
    hw = h * w

    # Channel-major view: free reshape, no transpose through HBM.
    x_rows = x_nchw.reshape(n, c_in, hw)

    # Pixel tile: lane-dense multiple of 128, capped near the row size.
    tile = min(tile_hw, _round_up(hw, 128))
    tile = _round_up(tile, 128)
    grid = (n, pl.cdiv(hw, tile))  # ragged tail handled by masked stores

    x_spec = pl.BlockSpec((None, c_in, tile), lambda b, p: (b, 0, p))
    w_spec = pl.BlockSpec((c_out, c_in), lambda b, p: (0, 0))
    o_spec = pl.BlockSpec((None, c_out, tile), lambda b, p: (b, 0, p))

    cost = pl.CostEstimate(
        flops=2 * n * hw * c_in * c_out,
        bytes_accessed=(x_rows.dtype.itemsize * n * hw * (c_in + c_out)
                        + 4 * c_in * c_out),
        transcendentals=0,
    )
    compiler_params = pltpu.CompilerParams(
        dimension_semantics=("parallel", "parallel"),
        vmem_limit_bytes=vmem_limit_bytes,
    )
    out_shape = jax.ShapeDtypeStruct((n, c_out, hw), x_rows.dtype)

    if bn_relu:
        # Fold BN (running stats) into per-channel scale/bias, fused in-kernel.
        scale = (bn_gamma.astype(jnp.float32)
                 / jnp.sqrt(bn_var.astype(jnp.float32) + eps))
        bias = bn_beta.astype(jnp.float32) - bn_mean.astype(jnp.float32) * scale
        out_rows = pl.pallas_call(
            _reducer_bn_relu_kernel,
            out_shape=out_shape,
            grid_spec=pltpu.PrefetchScalarGridSpec(
                num_scalar_prefetch=0,
                grid=grid,
                in_specs=[
                    x_spec,
                    w_spec,
                    pl.BlockSpec((c_out, 1), lambda b, p: (0, 0)),
                    pl.BlockSpec((c_out, 1), lambda b, p: (0, 0)),
                ],
                out_specs=o_spec,
            ),
            compiler_params=compiler_params,
            cost_estimate=cost,
        )(x_rows, conv_w, scale.reshape(c_out, 1), bias.reshape(c_out, 1))
    else:
        out_rows = pl.pallas_call(
            _reducer_conv_kernel,
            out_shape=out_shape,
            grid_spec=pltpu.PrefetchScalarGridSpec(
                num_scalar_prefetch=0,
                grid=grid,
                in_specs=[x_spec, w_spec],
                out_specs=o_spec,
            ),
            compiler_params=compiler_params,
            cost_estimate=cost,
        )(x_rows, conv_w)

    # (N, C_out, H*W) -> (N, C_out, H, W): free reshape, still channel-major.
    return out_rows.reshape(n, c_out, h, w)


if __name__ == "__main__":
    # Small shapes consistent with the module (Reducer(in_channels, reduce)).
    N, C_IN, H, W = 2, 32, 16, 16
    C_OUT = 16

    key = jax.random.PRNGKey(0)
    k_x, k_w, k_g, k_b, k_m, k_v = jax.random.split(key, 6)

    x = jax.random.normal(k_x, (N, C_IN, H, W), dtype=jnp.float32)
    conv_w = jax.random.normal(k_w, (C_OUT, C_IN), dtype=jnp.float32) * 0.05
    bn_gamma = 1.0 + 0.1 * jax.random.normal(k_g, (C_OUT,), dtype=jnp.float32)
    bn_beta = 0.1 * jax.random.normal(k_b, (C_OUT,), dtype=jnp.float32)
    bn_mean = 0.1 * jax.random.normal(k_m, (C_OUT,), dtype=jnp.float32)
    bn_var = jnp.abs(1.0 + 0.1 * jax.random.normal(k_v, (C_OUT,),
                                                   dtype=jnp.float32))
    eps = 1e-5

    # Reference (plain JAX): 1x1 conv == einsum over channels.
    ref_conv = jnp.einsum("nchw,oc->nohw", x, conv_w)
    scale = bn_gamma / jnp.sqrt(bn_var + eps)
    bias = bn_beta - bn_mean * scale
    ref_bn = jnp.maximum(
        ref_conv * scale[None, :, None, None] + bias[None, :, None, None], 0.0)

    # bn_relu=True path (conv + BN(eval) + ReLU fused).
    out = reducer_forward(x, conv_w, bn_gamma, bn_beta, bn_mean, bn_var,
                          bn_relu=True, eps=eps)
    out = jax.block_until_ready(out)
    assert out.shape == (N, C_OUT, H, W)
    assert jnp.allclose(out, ref_bn, atol=1e-4, rtol=1e-4)

    # bn_relu=False path (plain 1x1 conv, no BN, no ReLU).
    out_plain = reducer_forward(x, conv_w, bn_relu=False)
    out_plain = jax.block_until_ready(out_plain)
    assert out_plain.shape == (N, C_OUT, H, W)
    assert jnp.allclose(out_plain, ref_conv, atol=1e-4, rtol=1e-4)

    print("KERNEL_OK")
</pallas_src>

<mosaic_0001>
module attributes {stable_mosaic.version = 11 : i64} {
  func.func @_reducer_bn_relu_kernel(%arg0: i32, %arg1: i32, %arg2: memref<1x32x256xf32, #tpu.memory_space<vmem>>, %arg3: memref<16x32xf32, #tpu.memory_space<vmem>>, %arg4: memref<16x1xf32, #tpu.memory_space<vmem>>, %arg5: memref<16x1xf32, #tpu.memory_space<vmem>>, %arg6: memref<1x16x256xf32, #tpu.memory_space<vmem>>) attributes {dimension_semantics = [#tpu.dimension_semantics<parallel>, #tpu.dimension_semantics<parallel>], iteration_bounds = array<i64: 2, 1>, scalar_prefetch = 0 : i64, scratch_operands = 0 : i64, tpu.core_type = #tpu.core_type<tc>, window_params = [{transform_indices = @transform_0, window_bounds = array<i64: 1, 32, 256>}, {pipeline_mode = #tpu.pipeline_mode<synchronous>, transform_indices = @transform_1, window_bounds = array<i64: 16, 32>}, {pipeline_mode = #tpu.pipeline_mode<synchronous>, transform_indices = @transform_2, window_bounds = array<i64: 16, 1>}, {pipeline_mode = #tpu.pipeline_mode<synchronous>, transform_indices = @transform_3, window_bounds = array<i64: 16, 1>}, {transform_indices = @transform_4, window_bounds = array<i64: 1, 16, 256>}]} {
    %c0 = arith.constant 0 : index
    %c0_0 = arith.constant 0 : index
    %0 = vector.load %arg3[%c0, %c0_0] : memref<16x32xf32, #tpu.memory_space<vmem>>, vector<16x32xf32>
    %c0_1 = arith.constant 0 : index
    %c0_2 = arith.constant 0 : index
    %c0_3 = arith.constant 0 : index
    %1 = vector.load %arg2[%c0_1, %c0_2, %c0_3] : memref<1x32x256xf32, #tpu.memory_space<vmem>>, vector<1x32x256xf32>
    %2 = vector.shape_cast %1 : vector<1x32x256xf32> to vector<32x256xf32>
    %cst = arith.constant dense<0.000000e+00> : vector<16x256xf32>
    %3 = tpu.matmul %0, %2, %cst {dimension_numbers = #tpu.dot_dimension_numbers<[1], [0], [0], [1], [0, 0, 1, 1], [], []>} : vector<16x32xf32>, vector<32x256xf32>, vector<16x256xf32> -> vector<16x256xf32>
    %c0_4 = arith.constant 0 : index
    %c0_5 = arith.constant 0 : index
    %4 = vector.load %arg4[%c0_4, %c0_5] : memref<16x1xf32, #tpu.memory_space<vmem>>, vector<16x1xf32>
    %5 = vector.broadcast %4 : vector<16x1xf32> to vector<16x256xf32>
    %6 = arith.mulf %3, %5 : vector<16x256xf32>
    %c0_6 = arith.constant 0 : index
    %c0_7 = arith.constant 0 : index
    %7 = vector.load %arg5[%c0_6, %c0_7] : memref<16x1xf32, #tpu.memory_space<vmem>>, vector<16x1xf32>
    %8 = vector.broadcast %7 : vector<16x1xf32> to vector<16x256xf32>
    %9 = arith.addf %6, %8 : vector<16x256xf32>
    %cst_8 = arith.constant 0.000000e+00 : f32
    %10 = vector.broadcast %cst_8 : f32 to vector<16x256xf32>
    %11 = arith.maximumf %9, %10 : vector<16x256xf32>
    %c0_9 = arith.constant 0 : index
    %c0_10 = arith.constant 0 : index
    %c0_11 = arith.constant 0 : index
    %12 = vector.load %arg6[%c0_9, %c0_10, %c0_11] : memref<1x16x256xf32, #tpu.memory_space<vmem>>, vector<1x16x256xf32>
    %13 = vector.shape_cast %12 : vector<1x16x256xf32> to vector<16x256xf32>
    %14 = vector.shape_cast %11 : vector<16x256xf32> to vector<1x16x256xf32>
    tpu.vector_store %arg6[%c0_9, %c0_10, %c0_11], %14 {strides = array<i32>} : memref<1x16x256xf32, #tpu.memory_space<vmem>>, vector<1x16x256xf32>,
    return
  }
  func.func @transform_0(%arg0: i32, %arg1: i32) -> (i32, i32, i32) {
    %c0_i32 = arith.constant 0 : i32
    %c0_i32_0 = arith.constant 0 : i32
    return %arg0, %c0_i32, %arg1 : i32, i32, i32
  }
  func.func @transform_1(%arg0: i32, %arg1: i32) -> (i32, i32) {
    %c0_i32 = arith.constant 0 : i32
    %c0_i32_0 = arith.constant 0 : i32
    %c0_i32_1 = arith.constant 0 : i32
    return %c0_i32, %c0_i32_0 : i32, i32
  }
  func.func @transform_2(%arg0: i32, %arg1: i32) -> (i32, i32) {
    %c0_i32 = arith.constant 0 : i32
    %c0_i32_0 = arith.constant 0 : i32
    %c0_i32_1 = arith.constant 0 : i32
    return %c0_i32, %c0_i32_0 : i32, i32
  }
  func.func @transform_3(%arg0: i32, %arg1: i32) -> (i32, i32) {
    %c0_i32 = arith.constant 0 : i32
    %c0_i32_0 = arith.constant 0 : i32
    %c0_i32_1 = arith.constant 0 : i32
    return %c0_i32, %c0_i32_0 : i32, i32
  }
  func.func @transform_4(%arg0: i32, %arg1: i32) -> (i32, i32, i32) {
    %c0_i32 = arith.constant 0 : i32
    %c0_i32_0 = arith.constant 0 : i32
    return %arg0, %c0_i32, %arg1 : i32, i32, i32
  }
}

</mosaic_0001>

<bundles_post_ra>
// kernel: tpu_custom_call.1
= control target key start
LH: loop header
LB: loop body
LE: loop exit
PB: predicated region body
PF: predicated region fallthrough
CT: control target
= control target key end

     0   :  { %9 = vsyncpa [#allocation3], 0  ;;  %s827_s0 = inlined_call_operand.hbm [shape: f32[2,32,256], index: 0, kind: input, shape index: {}]   ;;  %s828_s1 = inlined_call_operand.vmem [shape: f32[16,32], index: 1, kind: input, shape index: {}]   ;;  %s829_s2 = inlined_call_operand.vmem [shape: f32[16,1], index: 2, kind: input, shape index: {}]   ;;  %s830_s3 = inlined_call_operand.vmem [shape: f32[16,1], index: 3, kind: input, shape index: {}]   ;;  %s831_s4 = inlined_call_operand.hbm [shape: f32[2,16,256], index: 4, kind: output, shape index: {}]  }
   0x1   :  { %11 = vsyncpa [#allocation3 + $0x1], 0 }
   0x2   :  { %12 = vsyncpa [#allocation4], 0 }
   0x3   :  { %14 = vsyncpa [#allocation4 + $0x1], 0  ;;  %s688_s15 = smov 0   ;;  %s690_s16 = smov 0  }
   0x4   :  { %s692_s17 = smov 0   ;;  %s694_s18 = smov 0  }
   0x5   :  { %s696_s19 = smov 0   ;;  %s698_s20 = smov 0  }
   0x6 LB: > { %s446_s21 = sadd.s32 4294967295, %s656_s20   ;;  %s447_s22 = sadd.s32 4294967294, %s656_s20   ;;  %s656_s20 = sphi %s698_s20, %s20_s20   ;;  %s652_s19 = sphi %s696_s19, %s840_s19   ;;  %s648_s18 = sphi %s694_s18, %s839_s18   ;;  %s644_s17 = sphi %s692_s17, %s838_s17   ;;  %s640_s16 = sphi %s690_s16, %s837_s16   ;;  %s636_s15 = sphi %s688_s15, %s836_s15  }
   0x7   : > { %s32_s23 = sadd.s32 1, %s652_s19  ;;  %s41_s24 = sadd.s32 1, %s644_s17 }
   0x8   : > { %p34_p0 = scmp.ge.s32.totalorder %s32_s23, 2  ;;  %p48_p1 = scmp.ne.s32.totalorder %s644_s17, %s640_s16 }
   0x9   : > { %p49_p2 = scmp.eq.s32.totalorder %s656_s20, 0  ;;  %p54_p3 = scmp.ne.s32.totalorder %s640_s16, %s636_s15 }
   0xa   : > { %s842_s23 = smov (%p34_p0, %s32_s23), 0  ;;  %p55_p5 = scmp.eq.s32.totalorder %s446_s21, 0 }
   0xb   : > { %p729_p4 = por %p49_p2, %p48_p1  ;;  %s36_s26 = ssub.s32 %s652_s19, %s842_s23 }
   0xc   : > { %p143_p6 = scmp.eq.s32.totalorder %s446_s21, 1  ;;  %p39_p7 = scmp.eq.s32.totalorder %s36_s26, 0 }
   0xd   : > { %p735_p8 = por %p55_p5, %p54_p3  ;;  %p149_p10 = scmp.eq.s32.totalorder %s447_s22, 1 }
   0xe   : > { %p739_p9 = por %p143_p6, %p48_p1  ;;  %p449_p12 = scmp.ge.s32.totalorder %s656_s20, 2 }
   0xf   : > { %s744_s29 = scalar_select %p39_p7, %s644_s17, %s41_s24  }
  0x10   : > { %p746_p11 = por %p149_p10, %p54_p3  ;;  %p487_p13 = scmp.lt.s32.totalorder %s656_s20, 2 }
  0x11   : > { %s178_s5 = sand.u32 1, %s644_s17   ;;  %s465_s7 = sshll.u32 %s652_s19, 6 }
  0x12   : > { %s450_s6 = sshll.u32 %s178_s5, 6  ;;  %s189_s10 = scalar_lea.hbm %s827_s0, %s465_s7 }
  0x13   : > { %s182_s11 = scalar_lea.vmem [#allocation2], %s450_s6  ;;  %s190_s13 = sshll.u32 %s189_s10, 4  ;;  %s191_s13 = int_to_ptr.hbm [resolvable:$true] %s190_s13 }
  0x14   : > { %s192_s12 = sshll.u32 %s182_s11, 4  ;;  %p480_p0 = pnand %p487_p13, %p729_p4  ;;  %s193_s12 = int_to_ptr.vmem [resolvable:$true] %s192_s12 }
  0x15   : > { %p453_p1 = scmp.ge.s32.totalorder %s656_s20, 1  ;;  %s179_s14 = scalar_lea.sflag [#allocation3], %s178_s5 }
  0x16   : > { %s658_s21 = smov 256   ;;  %s659_s22 = smov 16  }
  0x17   : > { %482 = dma.hbm_to_vmem [thread:$0]  (!%p480_p0), %s191_s13, 1024, %s193_s12, %s179_s14, %s658_s21, %s658_s21, %s659_s22  }
  0x18   : > { %p200_p2 = scmp.lt.s32.totalorder %s656_s20, 3 }
  0x1a   : > { %p201_p3 = pnand %p453_p1, %p200_p2 }
  0x1b   : > { %s762_s24 = sand.u32 (!%p201_p3), 1, %s640_s16  }
  0x1c   : > { %204 = sbr.rel (%p201_p3) target bundleno = 187 (0xbb), region = 36  ;;  %s454_s26 = sshll.u32 (!%p201_p3), %s762_s24, 6 }
  0x1d   : > { %s207_s6 = scalar_lea.sflag (!%p201_p3), [#allocation3], %s762_s24  ;;  %s210_s7 = scalar_lea.vmem (!%p201_p3), [#allocation2], %s454_s26 }
  0x21   : > { %627 = dma.done.wait (%p735_p8), %s207_s6, 1024  }
  0x22   : > { %629 = vsyncadd (%p735_p8), %s207_s6, 4294966272  ;;  %v660_v0 = vmov 0   ;;  %v246_v1 = vld [vmem:[%s210_s7 + $0x30] sm:$0xff]  ;;  %v247_v2 = vld [vmem:[%s210_s7 + $0x38] sm:$0xff]  ;;  %vm248_vm0 = vcmask 261120   ;;  %s455_s26 = sshll.u32 %s762_s24, 5 }
  0x23   : > { %542 = vset.pattern.permute.xlu0 %v660_v0  ;;  %543 = vset.pattern.permute.xlu1 %v660_v0  ;;  %v244_v3 = vld [vmem:[%s210_s7 + $0x20] sm:$0xff]  ;;  %v245_v4 = vld [vmem:[%s210_s7 + $0x28] sm:$0xff]  ;;  %v242_v5 = vld [vmem:[%s210_s7 + $0x10] sm:$0xff]  ;;  %s466_s6 = sshll.u32 %s648_s18, 5  ;;  %s235_s5 = scalar_lea.vmem [#allocation5], %s455_s26 }
  0x24   : > { %267 = vmatpush.msra.mxu0 %v246_v1  ;;  %467 = vmatpush.msra.mxu2 %v246_v1  ;;  %v243_v6 = vld [vmem:[%s210_s7 + $0x18] sm:$0xff]  ;;  %v240_v7 = vld [vmem:[%s210_s7] sm:$0xff]  ;;  %v241_v8 = vld [vmem:[%s210_s7 + $0x8] sm:$0xff]  ;;  %s355_s27 = scalar_lea.hbm %s831_s4, %s466_s6  ;;  %s356_s8 = sshll.u32 %s235_s5, 4  ;;  %s357_s8 = int_to_ptr.vmem [resolvable:$true] %s356_s8 }
  0x25   : > { %290 = vmatpush.msra.mxu1 %v247_v2  ;;  %471 = vmatpush.msra.mxu3 %v247_v2  ;;  %v238_v9 = vld [vmem:[%s828_s1] sm:$0xff]  ;;  %v239_v10 = vld [vmem:[%s828_s1 + $0x8] sm:$0xff]  ;;  %s358_s18 = sshll.u32 %s355_s27, 4  ;;  %s342_s9 = scalar_lea.sflag [#allocation4], %s762_s24  ;;  %s359_s18 = int_to_ptr.hbm [resolvable:$true] %s358_s18 }
  0x26   : > { %268 = vmatpush.msra.mxu0 %v244_v3  ;;  %468 = vmatpush.msra.mxu2 %v244_v3  ;;  %v301_v11 = vld [vmem:[%s829_s2] sm:$0xff]  ;;  %v302_v13 = vld [vmem:[%s829_s2 + $0x8] sm:$0xff]  ;;  %s588_s10 = sshra.s32 %s359_s18, 4  ;;  %s594_s14 = scalar_lea.hbm %s831_s4, 64  ;;  %s589_s10 = int_to_ptr.hbm [resolvable:$true] %s588_s10 }
  0x27   : > { %291 = vmatpush.msra.mxu1 %v245_v4  ;;  %472 = vmatpush.msra.mxu3 %v245_v4  ;;  %v317_v12 = vld [vmem:[%s830_s3] sm:$0xff]  ;;  %v318_v14 = vld [vmem:[%s830_s3 + $0x8] sm:$0xff]  ;;  %s590_s11 = scalar_lea.hbm %s589_s10, 32  ;;  %p595_p7 = scmp.lt.s32.totalorder %s589_s10, %s831_s4 }
  0x28   : > { %269 = vmatpush.msra.mxu0 %v242_v5  ;;  %469 = vmatpush.msra.mxu2 %v242_v5  ;;  %p591_p4 = scmp.ne.s32.totalorder %s589_s10, %s590_s11  ;;  %p596_p8 = scmp.lt.s32.totalorder %s594_s14, %s590_s11 }
  0x29   : > { %292 = vmatpush.msra.mxu1 %v243_v6  ;;  %473 = vmatpush.msra.mxu3 %v243_v6 }
  0x2a   : > { %270 = vmatpush.msra.mxu0 %v240_v7  ;;  %470 = vmatpush.msra.mxu2 %v240_v7  ;;  %p592_p5 = pnand %p591_p4, %p739_p9  ;;  %p597_p10 = por %p596_p8, %p595_p7 }
  0x2b   : > { %293 = vmatpush.msra.mxu1 %v241_v8  ;;  %474 = vmatpush.msra.mxu3 %v241_v8 }
  0x2c   : > { %456 = vmatmul.msk.f32.vlgmr.msra.gmra.mxu0 %vm248_vm0, %v238_v9  ;;  %457 = vmatmul.msk.f32.vlgmr.msra.gmra.mxu2 %vm248_vm0, %v239_v10  ;;  %p593_p6 = pneg %p592_p5 }
  0x2d   : > { %458 = vmatmul.msk.f32.vlgmr.msra.gmra.mxu1 %vm248_vm0, %v238_v9  ;;  %459 = vmatmul.msk.f32.vlgmr.msra.gmra.mxu3 %vm248_vm0, %v239_v10 }
  0x2e   : > { %305 = vperm.xlu0 %542, %v301_v11   ;;  %321 = vperm.xlu1 %543, %v317_v12   ;;  %p598_p13 = pnand %p597_p10, %p593_p6 }
  0x36   : > { %310 = vperm.xlu0 %542, %v302_v13   ;;  %326 = vperm.xlu1 %543, %v318_v14  }
  0xa0   : > { %v306_v15 = vpop.permute.xlu0 %305  ;;  %v322_v16 = vpop.permute.xlu1 %321 }
  0xa8   : > { %v311_v24 = vpop.permute.xlu0 %310  ;;  %v327_v29 = vpop.permute.xlu1 %326 }
  0xa9   : > { %v272_v17 = vpop.f32.mrf.mxu0 }
  0xaa   : > { %v313_v18 = vmul.f32 %v306_v15, %v272_v17  ;;  %v295_v19 = vpop.f32.mrf.mxu1 }
  0xab   : > { %v314_v20 = vmul.f32 %v306_v15, %v295_v19 }
  0xac   : > { %v329_v21 = vadd.f32 %v322_v16, %v313_v18 }
  0xad   : > { %v330_v22 = vadd.f32 %v322_v16, %v314_v20 }
  0xae   : > { %v333_v23 = vmax.f32 %v329_v21, 0.0 }
  0xaf   : > { %v334_v25 = vmax.f32 %v330_v22, 0.0  ;;  %v275_v26 = vpop.f32.mrf.mxu2 }
  0xb0   : > { %337 = vst [vmem:[%s235_s5] sm:$0xff] %v333_v23  ;;  %v315_v27 = vmul.f32 %v311_v24, %v275_v26  ;;  %v298_v28 = vpop.f32.mrf.mxu3 }
  0xb1   : > { %338 = vst [vmem:[%s235_s5 + $0x8] sm:$0xff] %v334_v25  ;;  %v316_v30 = vmul.f32 %v311_v24, %v298_v28 }
  0xb2   : > { %v331_v31 = vadd.f32 %v327_v29, %v315_v27 }
  0xb3   : > { %v332_v32 = vadd.f32 %v327_v29, %v316_v30 }
  0xb4   : > { %v335_v33 = vmax.f32 %v331_v31, 0.0 }
  0xb5   : > { %v336_v34 = vmax.f32 %v332_v32, 0.0 }
  0xb6   : > { %339 = vst [vmem:[%s235_s5 + $0x10] sm:$0xff] %v335_v33 }
  0xb7   : > { %340 = vst [vmem:[%s235_s5 + $0x18] sm:$0xff] %v336_v34 }
  0xb8   : > { %601 = shalt.err (!%p598_p13)
}
  0xb9   : > { %s661_s24 = smov 256   ;;  %s662_s26 = smov 16  }
  0xba   : > { %477 = dma.vmem_to_hbm [thread:$0]  (%p739_p9), %s357_s8, 512, %s359_s18, %s342_s9, %s661_s24, %s661_s24, %s662_s26  }
  0xbb PF: > { %s373_s6 = sand.u32 1, %s636_s15   ;;  %p484_p0 = pnand %p449_p12, %p746_p11 }
  0xbc   : > { %s374_s7 = scalar_lea.sflag [#allocation4], %s373_s6 }
  0xbd   : > { %p485_p1 = pneg %p484_p0 }
  0xbf   : > { %631 = dma.done.wait (%p485_p1), %s374_s7, 512  }
  0xc0   : > { %633 = vsyncadd (%p485_p1), %s374_s7, 4294966784  ;;  %s20_s20 = sadd.s32 1, %s656_s20   ;;  %s836_s15 = smov %s640_s16 }
  0xc1   : > { %p17_p2 = scmp.ge.s32.totalorder %s20_s20, 4   ;;  %s837_s16 = smov %s644_s17 }
  0xc2   : > { %s838_s17 = smov %s744_s29  ;;  %s839_s18 = smov %s652_s19 }
  0xc3   : > { %s840_s19 = smov %s842_s23  ;;  %19 = sbr.rel (!%p17_p2) target bundleno = 6 (0x6), region = 81 }
  0xc8   :  { %380 = vsyncpa [#allocation3], 1 }
  0xc9   :  { %382 = vsyncpa [#allocation3 + $0x1], 1 }
  0xca   :  { %383 = vsyncpa [#allocation4], 1 }
  0xcb   :  { %385 = vsyncpa [#allocation4 + $0x1], 1 }

</bundles_post_ra>
